<compile_context>
chip_gen: v5e
topology: v5e:2x2
jax: 0.10.0
libtpu: 0.0.40
codegen_flags: <defaults>
</compile_context>

<pallas_src>
import functools
import math

import jax
import jax.numpy as jnp
from jax.experimental import pallas as pl
from jax.experimental.pallas import tpu as pltpu

_LANE = 128
_SUB = 8
_MAX_BLOCK_ROWS = 4096   # 4096 x 128 x 4B = 2 MiB per f32 block


def _round_up(x, m):
    return ((x + m - 1) // m) * m


def _voxel_to_element_kernel(x_ref, o_ref, *, sharp_coe):
    # Cast in-kernel (input may be bf16/f32/...); compute in f32.
    x = x_ref[...].astype(jnp.float32)
    x = jnp.clip(x, 0.0, 1.0)
    y = jnp.sin((x - 0.5) * math.pi)                 # in [-1, 1]

    if sharp_coe is not None:
        coe = float(sharp_coe)
        if coe != 1.0:
            if coe.is_integer() and 2.0 <= coe <= 16.0:
                # signed power via VPU multiplies: sign(y)*|y|**k == y*|y|**(k-1)
                k = int(coe)
                ay = jnp.abs(y)
                p = ay
                for _ in range(k - 2):
                    p = p * ay
                y = y * p
            else:
                # general (non-integer) exponent: signed |y|**coe (EUP exp/log)
                a = jnp.abs(y) ** jnp.float32(coe)
                y = jnp.where(y >= 0.0, a, -a)

    o_ref[...] = ((y + 1.0) * 0.5).astype(o_ref.dtype)


def voxel_to_element_soft(voxel, sharp_coe=None):
    """Pallas TPU implementation of VoxelToElementSoft.forward.

    Args:
      voxel: any-shaped float array (e.g. NCHW / NCDHW voxel grid).
      sharp_coe: optional python float sharpening exponent (static).

    Returns:
      1-D array of size prod(voxel.shape) in the input's float dtype
      (matching the PyTorch flattened output).
    """
    out_dtype = (voxel.dtype if jnp.issubdtype(voxel.dtype, jnp.floating)
                 else jnp.float32)

    flat = voxel.reshape(-1)
    n = flat.shape[0]
    if n == 0:
        return jnp.zeros((0,), out_dtype)

    # Pad up to a (8 x 128) element multiple so the 2-D view is vreg-tileable
    # (rows always a multiple of 8, lanes exactly 128 -> unmasked vld/vst).
    tile_elems = _SUB * _LANE
    n_pad = _round_up(n, tile_elems)
    if n_pad != n:
        flat = jnp.pad(flat, (0, n_pad - n))

    rows = n_pad // _LANE
    x2d = flat.reshape(rows, _LANE)

    # Block-row choice:
    #   * tiny inputs -> one full-array block,
    #   * medium inputs -> split into >= 2 blocks (multiple of 8 rows) so the
    #     v7x megacore can shard the "parallel" grid axis,
    #   * large inputs -> cap at ~2 MiB f32 per block (HBM-roofline sized).
    if rows <= 2 * _SUB:
        block_rows = rows
    else:
        block_rows = min(_MAX_BLOCK_ROWS, _round_up(pl.cdiv(rows, 2), _SUB))
    grid = (pl.cdiv(rows, block_rows),)

    kernel = functools.partial(_voxel_to_element_kernel, sharp_coe=sharp_coe)

    out2d = pl.pallas_call(
        kernel,
        out_shape=jax.ShapeDtypeStruct((rows, _LANE), out_dtype),
        grid=grid,
        in_specs=[pl.BlockSpec((block_rows, _LANE), lambda i: (i, 0))],
        out_specs=pl.BlockSpec((block_rows, _LANE), lambda i: (i, 0)),
        compiler_params=pltpu.CompilerParams(
            dimension_semantics=("parallel",),
            vmem_limit_bytes=32 * 1024 * 1024),
    )(x2d)

    out = out2d.reshape(-1)
    if n_pad != n:
        out = out[:n]
    return out


def _reference(voxel, sharp_coe=None):
    """Plain-JAX reference mirroring the PyTorch forward exactly."""
    e = jnp.clip(voxel.astype(jnp.float32), 0.0, 1.0).reshape(-1)
    e = jnp.sin((e - 0.5) * math.pi)
    if sharp_coe is not None and float(sharp_coe) != 1.0:
        a = jnp.abs(e) ** jnp.float32(sharp_coe)
        e = jnp.where(e >= 0.0, a, -a)
    return (e + 1.0) * 0.5


if __name__ == "__main__":
    key = jax.random.PRNGKey(0)
    # Small voxel grid, NCHW-like: batch=2, channels=4, spatial=16x16.
    voxel = jax.random.uniform(key, (2, 4, 16, 16), dtype=jnp.float32,
                               minval=-0.5, maxval=1.5)

    # Case 1: no sharpening (sharp_coe=None) -> identity sharpen branch.
    out_none = voxel_to_element_soft(voxel, sharp_coe=None)
    jax.block_until_ready(out_none)
    ref_none = _reference(voxel, sharp_coe=None)
    assert out_none.shape == (2 * 4 * 16 * 16,)
    assert jnp.allclose(out_none, ref_none, atol=1e-5, rtol=1e-5)

    # Case 2: integer sharpening exponent -> multiply-chain branch.
    out_sharp = voxel_to_element_soft(voxel, sharp_coe=2.0)
    jax.block_until_ready(out_sharp)
    ref_sharp = _reference(voxel, sharp_coe=2.0)
    assert jnp.allclose(out_sharp, ref_sharp, atol=1e-5, rtol=1e-5)

    # Case 3: non-integer exponent + ragged size -> pow branch + pad/tail path.
    key2 = jax.random.PRNGKey(0)
    voxel_odd = jax.random.uniform(key2, (3, 5, 7), dtype=jnp.float32,
                                   minval=-0.5, maxval=1.5)
    out_odd = voxel_to_element_soft(voxel_odd, sharp_coe=1.5)
    jax.block_until_ready(out_odd)
    ref_odd = _reference(voxel_odd, sharp_coe=1.5)
    assert out_odd.shape == (3 * 5 * 7,)
    assert jnp.allclose(out_odd, ref_odd, atol=1e-5, rtol=1e-5)

    # Case 4: larger grid exercising the multi-block / megacore-split path.
    key3 = jax.random.PRNGKey(0)
    voxel_big = jax.random.uniform(key3, (2, 4, 32, 32, 32), dtype=jnp.float32,
                                   minval=-0.5, maxval=1.5)
    out_big = voxel_to_element_soft(voxel_big, sharp_coe=2.0)
    jax.block_until_ready(out_big)
    ref_big = _reference(voxel_big, sharp_coe=2.0)
    assert jnp.allclose(out_big, ref_big, atol=1e-5, rtol=1e-5)

    print("KERNEL_OK")
</pallas_src>

<mosaic_0001>
module attributes {stable_mosaic.version = 11 : i64} {
  func.func @_voxel_to_element_kernel(%arg0: i32, %arg1: memref<16x128xf32, #tpu.memory_space<vmem>>, %arg2: memref<16x128xf32, #tpu.memory_space<vmem>>) attributes {dimension_semantics = [#tpu.dimension_semantics<parallel>], iteration_bounds = array<i64: 1>, scalar_prefetch = 0 : i64, scratch_operands = 0 : i64, tpu.core_type = #tpu.core_type<tc>, window_params = [{transform_indices = @transform_0, window_bounds = array<i64: 16, 128>}, {transform_indices = @transform_1, window_bounds = array<i64: 16, 128>}]} {
    %c0 = arith.constant 0 : index
    %c0_0 = arith.constant 0 : index
    %0 = vector.load %arg1[%c0, %c0_0] : memref<16x128xf32, #tpu.memory_space<vmem>>, vector<16x128xf32>
    %cst = arith.constant 0.000000e+00 : f32
    %cst_1 = arith.constant 1.000000e+00 : f32
    %1 = vector.broadcast %cst : f32 to vector<16x128xf32>
    %2 = arith.maximumf %1, %0 : vector<16x128xf32>
    %3 = vector.broadcast %cst_1 : f32 to vector<16x128xf32>
    %4 = arith.minimumf %3, %2 : vector<16x128xf32>
    %cst_2 = arith.constant 5.000000e-01 : f32
    %5 = vector.broadcast %cst_2 : f32 to vector<16x128xf32>
    %6 = arith.subf %4, %5 : vector<16x128xf32>
    %cst_3 = arith.constant 3.14159274 : f32
    %7 = vector.broadcast %cst_3 : f32 to vector<16x128xf32>
    %8 = arith.mulf %6, %7 : vector<16x128xf32>
    %9 = math.sin %8 : vector<16x128xf32>
    %cst_4 = arith.constant 1.000000e+00 : f32
    %10 = vector.broadcast %cst_4 : f32 to vector<16x128xf32>
    %11 = arith.addf %9, %10 : vector<16x128xf32>
    %cst_5 = arith.constant 5.000000e-01 : f32
    %12 = vector.broadcast %cst_5 : f32 to vector<16x128xf32>
    %13 = arith.mulf %11, %12 : vector<16x128xf32>
    %c0_6 = arith.constant 0 : index
    %c0_7 = arith.constant 0 : index
    %14 = vector.load %arg2[%c0_6, %c0_7] : memref<16x128xf32, #tpu.memory_space<vmem>>, vector<16x128xf32>
    tpu.vector_store %arg2[%c0_6, %c0_7], %13 {strides = array<i32>} : memref<16x128xf32, #tpu.memory_space<vmem>>, vector<16x128xf32>,
    return
  }
  func.func @transform_0(%arg0: i32) -> (i32, i32) {
    %c0_i32 = arith.constant 0 : i32
    %c0_i32_0 = arith.constant 0 : i32
    return %arg0, %c0_i32 : i32, i32
  }
  func.func @transform_1(%arg0: i32) -> (i32, i32) {
    %c0_i32 = arith.constant 0 : i32
    %c0_i32_0 = arith.constant 0 : i32
    return %arg0, %c0_i32 : i32, i32
  }
}

</mosaic_0001>

<bundles_post_ra>
// kernel: tpu_custom_call.1
= control target key start
LH: loop header
LB: loop body
LE: loop exit
PB: predicated region body
PF: predicated region fallthrough
CT: control target
= control target key end

     0   :  { %6 = vsyncpa [#allocation3], 0  ;;  %s647_s0 = inlined_call_operand.hbm [shape: f32[16,128], index: 0, kind: input, shape index: {}]   ;;  %s648_s1 = inlined_call_operand.hbm [shape: f32[16,128], index: 1, kind: output, shape index: {}]  }
   0x1   :  { %7 = vsyncpa [#allocation4], 0  ;;  %s12_s8 = sshll.u32 %s647_s0, 4  ;;  %s441_s9 = smov [#allocation2]   ;;  %s13_s8 = int_to_ptr.hbm [resolvable:$true] %s12_s8 }
   0x2   :  { %s14_s10 = sshll.u32 %s441_s9, 4  ;;  %s442_s11 = smov 128   ;;  %s15_s10 = int_to_ptr.vmem [resolvable:$true] %s14_s10 }
   0x3   :  { %s443_s12 = smov 8  }
   0x4   :  { %20 = dma.hbm_to_vmem [thread:$0]  %s13_s8, 256, %s15_s10, [#allocation3], %s442_s11, %s442_s11, %s443_s12  }
   0x5   :  { %437 = dma.done.wait [#allocation3], 256  }
   0x6   :  { %438 = vsyncadd [#allocation3], 4294967040  ;;  %v25_v0 = vld [vmem:[#allocation2] sm:$0xff]  ;;  %v26_v1 = vld [vmem:[#allocation2 + $0x8] sm:$0xff]  ;;  %v444_v31 = vmov 683565275  }
   0x7   :  { %v27_v2 = vmax.f32 %v25_v0, 0.0  ;;  %v28_v3 = vmax.f32 %v26_v1, 0.0  ;;  %v445_v33 = vmov 2475754826   ;;  %v446_v35 = vmov 2131351028  }
   0x8   :  { %v447_v37 = vmov 2102212464   ;;  %v448_v39 = vmov 920167782   ;;  %v449_v48 = vmov 1326507024  }
   0x9   :  { %v29_v4 = vmin.f32 %v27_v2, 1.0  ;;  %v30_v5 = vmin.f32 %v28_v3, 1.0  ;;  %s451_s0 = smov [#allocation5]   ;;  %s357_s16 = sshll.u32 %s648_s1, 4  ;;  %s358_s16 = int_to_ptr.hbm [resolvable:$true] %s357_s16 }
   0xa   :  { %s355_s13 = sshll.u32 %s451_s0, 4  ;;  %s356_s13 = int_to_ptr.vmem [resolvable:$true] %s355_s13 }
   0xb   :  { %v370_v6 = vadd.f32 -0.5, %v29_v4  ;;  %v371_v7 = vadd.f32 -0.5, %v30_v5 }
   0xd   :  { %v468_v8 = vmul.f32 3.1415927, %v370_v6  ;;  %v470_v9 = vmul.f32 3.1415927, %v371_v7 }
   0xf   :  { %v35_v10 = vand.u32 2147483647, %v468_v8  ;;  %v38_v11 = vand.u32 2139095040, %v468_v8  ;;  %v190_v12 = vand.u32 2147483647, %v470_v9  ;;  %v193_v13 = vand.u32 2139095040, %v470_v9 }
  0x11   :  { %v39_v14 = vshrl.u32 %v38_v11, 23  ;;  %v42_v15 = vand.u32 8388607, %v35_v10  ;;  %v194_v16 = vshrl.u32 %v193_v13, 23  ;;  %v197_v20 = vand.u32 8388607, %v190_v12 }
  0x13   :  { %v372_v17 = vadd.s32 4294967169, %v39_v14  ;;  %v43_v18 = vor.u32 8388608, %v42_v15  ;;  %v375_v19 = vadd.s32 4294967169, %v194_v16  ;;  %v198_v25 = vor.u32 8388608, %v197_v20 }
  0x15   :  { %v45_v21 = vadd.s32 1, %v372_v17  ;;  %v200_v22 = vadd.s32 1, %v375_v19  ;;  %v480_v24 = vshll.u32 %v43_v18, 8  ;;  %v490_v42 = vshll.u32 %v198_v25, 8 }
  0x17   :  { %vm46_vm0 = vcmp.gt.s32.totalorder %v45_v21, 0  ;;  %vm201_vm1 = vcmp.gt.s32.totalorder %v200_v22, 0  ;;  %v84_v41 = vand.u32 65535, %v480_v24  ;;  %v85_v46 = vshrl.u32 %v480_v24, 16 }
  0x18   :  { %v47_v23 = vsel %vm46_vm0, %v45_v21, 0  ;;  %v202_v27 = vsel %vm201_vm1, %v200_v22, 0 }
  0x19   :  { %v49_v26 = vand.u32 31, %v47_v23  ;;  %v482_v28 = vshrl.u32 %v47_v23, 5  ;;  %v484_v29 = vand.u32 31, %v202_v27  ;;  %v508_v59 = vshrl.u32 %v202_v27, 5 }
  0x1b   :  { %v50_v30 = vsub.s32 32, %v49_v26  ;;  %v52_v32 = vshll.u32 %v444_v31, %v49_v26  ;;  %v55_v34 = vshll.u32 %v445_v33, %v49_v26  ;;  %v58_v36 = vshll.u32 %v446_v35, %v49_v26 }
  0x1c   :  { %v61_v38 = vshll.u32 %v447_v37, %v49_v26  ;;  %v64_v40 = vshll.u32 %v448_v39, %v49_v26  ;;  %vm67_vm2 = vcmp.lt.s32.totalorder %v482_v28, 1  ;;  %vm70_vm3 = vcmp.lt.s32.totalorder %v482_v28, 4 }
  0x1d   :  { %v53_v43 = vshrl.u32 %v445_v33, %v50_v30  ;;  %v56_v44 = vshrl.u32 %v446_v35, %v50_v30  ;;  %v59_v45 = vshrl.u32 %v447_v37, %v50_v30  ;;  %v62_v47 = vshrl.u32 %v448_v39, %v50_v30 }
  0x1e   :  { %v65_v49 = vshrl.u32 %v449_v48, %v50_v30  ;;  %v499_v53 = vsub.s32 32, %v484_v29  ;;  %v51_v54 = vshrl.u32 %v444_v31, %v50_v30  ;;  %vm69_vm4 = vcmp.lt.s32.totalorder %v482_v28, 3 }
  0x1f   :  { %v54_v50 = vor.u32 %v53_v43, %v52_v32  ;;  %v57_v51 = vor.u32 %v56_v44, %v55_v34  ;;  %v60_v52 = vor.u32 %v59_v45, %v58_v36  ;;  %v63_v55 = vor.u32 %v62_v47, %v61_v38 }
  0x20   :  { %v66_v56 = vor.u32 %v65_v49, %v64_v40  ;;  %vm68_vm5 = vcmp.lt.s32.totalorder %v482_v28, 2  ;;  %v207_v62 = vshll.u32 %v444_v31, %v484_v29  ;;  %v210_v63 = vshll.u32 %v445_v33, %v484_v29 }
  0x21   :  { %v75_v57 = vsel %vm67_vm2, %v54_v50, %v57_v51  ;;  %v79_v58 = vsel %vm67_vm2, %v57_v51, %v60_v52  ;;  %v76_v60 = vsel %vm70_vm3, %v63_v55, 920167782  ;;  %v72_v0 = vsel %vm70_vm3, %v60_v52, 2102212464 }
  0x22   :  { %v80_v61 = vsel %vm70_vm3, %v66_v56, 1326507024  ;;  %v77_v1 = vsel %vm69_vm4, %v60_v52, %v76_v60  ;;  %v208_v3 = vshrl.u32 %v445_v33, %v499_v53  ;;  %v71_v4 = vsel %vm67_vm2, %v51_v54, %v54_v50 }
  0x23   :  { %v81_v2 = vsel %vm69_vm4, %v63_v55, %v80_v61  ;;  %v78_v5 = vsel %vm68_vm5, %v75_v57, %v77_v1  ;;  %v211_v7 = vshrl.u32 %v446_v35, %v499_v53  ;;  %v73_v16 = vsel %vm69_vm4, %v57_v51, %v72_v0 }
  0x24   :  { %v82_v6 = vsel %vm68_vm5, %v79_v58, %v81_v2  ;;  %v108_v14 = vand.u32 65535, %v78_v5  ;;  %v109_v15 = vshrl.u32 %v78_v5, 16  ;;  %v533_v17 = vor.u32 %v208_v3, %v207_v62 }
  0x25   :  { %v86_v11 = vand.u32 65535, %v82_v6  ;;  %v87_v13 = vshrl.u32 %v82_v6, 16  ;;  %v535_v18 = vor.u32 %v211_v7, %v210_v63  ;;  %v213_v19 = vshll.u32 %v446_v35, %v484_v29 }
  0x26   :  { %v214_v23 = vshrl.u32 %v447_v37, %v499_v53  ;;  %v110_v26 = vmul.u32 %v108_v14, %v84_v41  ;;  %v111_v27 = vmul.u32 %v109_v15, %v84_v41  ;;  %v112_v30 = vmul.u32 %v108_v14, %v85_v46 }
  0x27   :  { %v88_v20 = vmul.u32 %v86_v11, %v84_v41  ;;  %v89_v21 = vmul.u32 %v87_v13, %v84_v41  ;;  %v90_v22 = vmul.u32 %v86_v11, %v85_v46  ;;  %v91_v25 = vmul.u32 %v87_v13, %v85_v46 }
  0x28   :  { %v113_v36 = vmul.u32 %v109_v15, %v85_v46  ;;  %v114_v40 = vshll.u32 %v111_v27, 16  ;;  %v115_v43 = vshrl.u32 %v111_v27, 16  ;;  %v116_v44 = vshll.u32 %v112_v30, 16 }
  0x29   :  { %v92_v32 = vshll.u32 %v89_v21, 16  ;;  %v93_v33 = vshrl.u32 %v89_v21, 16  ;;  %v94_v34 = vshll.u32 %v90_v22, 16  ;;  %v95_v38 = vshrl.u32 %v90_v22, 16 }
  0x2a   :  { %v117_v45 = vshrl.u32 %v112_v30, 16  ;;  %v216_v47 = vshll.u32 %v447_v37, %v484_v29  ;;  %v450_v49 = vmov 0   ;;  %vm118_vm7 = vc.u32 %v110_v26, %v114_v40 }
  0x2b   :  { %vm96_vm6 = vc.u32 %v88_v20, %v92_v32  ;;  %v98_v35 = vadd.s32 %v92_v32, %v88_v20  ;;  %v120_v41 = vadd.s32 %v114_v40, %v110_v26  ;;  %v217_v51 = vshrl.u32 %v448_v39, %v499_v53 }
  0x2c   :  { %v97_v50 = vsel %vm96_vm6, 1, %v450_v49  ;;  %v119_v46 = vsel %vm118_vm7, 1, %v450_v49  ;;  %v219_v54 = vshll.u32 %v448_v39, %v484_v29  ;;  %v215_v37 = vor.u32 %v214_v23, %v213_v19 }
  0x2d   :  { %v99_v52 = vadd.s32 %v97_v50, %v91_v25  ;;  %vm100_vm8 = vc.u32 %v98_v35, %v94_v34  ;;  %v121_v56 = vadd.s32 %v119_v46, %v113_v36  ;;  %vm122_vm9 = vc.u32 %v120_v41, %v116_v44 }
  0x2e   :  { %v101_v55 = vsel %vm100_vm8, 1, %v450_v49  ;;  %v123_v58 = vsel %vm122_vm9, 1, %v450_v49  ;;  %v218_v60 = vor.u32 %v217_v51, %v216_v47  ;;  %v220_v61 = vshrl.u32 %v449_v48, %v499_v53 }
  0x2f   :  { %v103_v57 = vadd.s32 %v101_v55, %v99_v52  ;;  %v552_v62 = vadd.s32 %v120_v41, %v116_v44  ;;  %v125_v63 = vadd.s32 %v123_v58, %v121_v56  ;;  %vm222_vm10 = vcmp.lt.s32.totalorder %v508_v59, 1 }
  0x30   :  { %vm224_vm11 = vcmp.lt.s32.totalorder %v508_v59, 3  ;;  %v221_v39 = vor.u32 %v220_v61, %v219_v54  ;;  %vm223_vm12 = vcmp.lt.s32.totalorder %v508_v59, 2  ;;  %vm225_vm13 = vcmp.lt.s32.totalorder %v508_v59, 4 }
  0x31   :  { %v104_v29 = vadd.s32 %v103_v57, %v93_v33  ;;  %v74_v0 = vsel %vm68_vm5, %v71_v4, %v73_v16  ;;  %v126_v1 = vadd.s32 %v125_v63, %v115_v43  ;;  %v230_v48 = vsel %vm222_vm10, %v533_v17, %v535_v18 }
  0x32   :  { %v231_v2 = vsel %vm225_vm13, %v218_v60, 920167782  ;;  %v234_v6 = vsel %vm222_vm10, %v535_v18, %v215_v37  ;;  %v239_v28 = vand.u32 65535, %v490_v42  ;;  %v235_v11 = vsel %vm225_vm13, %v221_v39, 1326507024 }
  0x33   :  { %v566_v3 = vadd.s32 %v104_v29, %v95_v38  ;;  %v232_v5 = vsel %vm224_vm11, %v215_v37, %v231_v2  ;;  %v127_v4 = vadd.s32 %v126_v1, %v117_v45  ;;  %v240_v13 = vshrl.u32 %v490_v42, 16 }
  0x34   :  { %v233_v7 = vsel %vm223_vm12, %v230_v48, %v232_v5  ;;  %v128_v14 = vmul.u32 %v480_v24, %v74_v0  ;;  %v236_v15 = vsel %vm224_vm11, %v218_v60, %v235_v11  ;;  %v206_v26 = vshrl.u32 %v444_v31, %v499_v53 }
  0x35   :  { %vm130_vm14 = vc.u32 %v566_v3, %v552_v62  ;;  %v263_v16 = vand.u32 65535, %v233_v7  ;;  %v131_v19 = vadd.s32 1, %v127_v4  ;;  %v237_v20 = vsel %vm223_vm12, %v234_v6, %v236_v15 }
  0x36   :  { %v264_v21 = vshrl.u32 %v233_v7, 16  ;;  %v241_v22 = vand.u32 65535, %v237_v20  ;;  %v242_v23 = vshrl.u32 %v237_v20, 16  ;;  %v227_v43 = vsel %vm225_vm13, %v215_v37, 2102212464 }
  0x37   :  { %v132_v25 = vsel %vm130_vm14, %v131_v19, %v127_v4  ;;  %v267_v24 = vmul.u32 %v263_v16, %v240_v13  ;;  %v265_v34 = vmul.u32 %v263_v16, %v239_v28  ;;  %v226_v45 = vsel %vm222_vm10, %v206_v26, %v533_v17 }
  0x38   :  { %v266_v27 = vmul.u32 %v264_v21, %v239_v28  ;;  %v133_v30 = vadd.s32 %v132_v25, %v128_v14  ;;  %v243_v32 = vmul.u32 %v241_v22, %v239_v28  ;;  %v244_v33 = vmul.u32 %v242_v23, %v239_v28 }
  0x39   :  { %v245_v36 = vmul.u32 %v241_v22, %v240_v13  ;;  %v246_v44 = vmul.u32 %v242_v23, %v240_v13  ;;  %v268_v31 = vmul.u32 %v264_v21, %v240_v13  ;;  %v271_v53 = vshll.u32 %v267_v24, 16 }
  0x3a   :  { %v269_v38 = vshll.u32 %v266_v27, 16  ;;  %v134_v40 = vadd.s32 536870912, %v133_v30  ;;  %v247_v35 = vshll.u32 %v244_v33, 16  ;;  %v228_v51 = vsel %vm224_vm11, %v535_v18, %v227_v43 }
  0x3b   :  { %v249_v47 = vshll.u32 %v245_v36, 16  ;;  %v248_v17 = vshrl.u32 %v244_v33, 16  ;;  %v270_v57 = vshrl.u32 %v266_v27, 16  ;;  %v250_v61 = vshrl.u32 %v245_v36, 16 }
  0x3c   :  { %v593_v50 = vshrl.u32 %v134_v40, 30  ;;  %vm251_vm15 = vc.u32 %v243_v32, %v247_v35  ;;  %v253_v41 = vadd.s32 %v247_v35, %v243_v32  ;;  %vm273_vm0 = vc.u32 %v265_v34, %v269_v38 }
  0x3d   :  { %v252_v52 = vsel %vm251_vm15, 1, %v450_v49  ;;  %v274_v46 = vsel %vm273_vm0, 1, %v450_v49  ;;  %v275_v54 = vadd.s32 %v269_v38, %v265_v34  ;;  %v272_v29 = vshrl.u32 %v267_v24, 16 }
  0x3e   :  { %v136_v55 = vshll.u32 %v593_v50, 30  ;;  %v254_v56 = vadd.s32 %v252_v52, %v246_v44  ;;  %vm255_vm1 = vc.u32 %v253_v41, %v249_v47  ;;  %v276_v58 = vadd.s32 %v274_v46, %v268_v31 }
  0x3f   :  { %v256_v37 = vsel %vm255_vm1, 1, %v450_v49  ;;  %vm277_vm2 = vc.u32 %v275_v54, %v271_v53  ;;  %v279_v48 = vadd.s32 %v275_v54, %v271_v53  ;;  %v229_v2 = vsel %vm223_vm12, %v226_v45, %v228_v51 }
  0x40   :  { %v137_v60 = vsub.s32 %v133_v30, %v136_v55  ;;  %v258_v63 = vadd.s32 %v256_v37, %v254_v56  ;;  %v278_v18 = vsel %vm277_vm2, 1, %v450_v49  ;;  %v283_v11 = vmul.u32 %v490_v42, %v229_v2 }
  0x41   :  { %v280_v39 = vadd.s32 %v278_v18, %v276_v58  ;;  %v129_v49 = vadd.s32 %v552_v62, %v566_v3  ;;  %v159_v36 = vsub.s32 4, %v593_v50  ;;  %vm37_vm7 = vcmp.lt.s32.totalorder %v468_v8, 0 }
  0x42   :  { %vm138_vm3 = vcmp.lt.s32.totalorder %v137_v60, 0  ;;  %v139_v0 = vsub.s32 0, %v137_v60  ;;  %v259_v1 = vadd.s32 %v258_v63, %v248_v17  ;;  %vm615_vm8 = vcmp.le.f32.partialorder %v35_v10, 0.7853982 }
  0x43   :  { %v281_v5 = vadd.s32 %v280_v39, %v270_v57  ;;  %v160_v45 = vsel %vm37_vm7, %v159_v36, %v593_v50  ;;  %vm192_vm11 = vcmp.lt.s32.totalorder %v470_v9, 0  ;;  %vm629_vm13 = vcmp.le.f32.partialorder %v190_v12, 0.7853982 }
  0x44   :  { %v140_v6 = vsel %vm138_vm3, %v139_v0, %v137_v60  ;;  %v260_v28 = vadd.s32 %v259_v1, %v250_v61  ;;  %v162_v51 = vsel %vm615_vm8, 0, %v160_v45  ;;  %vm178_vm15 = vweird.f32 %v468_v8 }
  0x45   :  { %v141_v4 = vclz %v140_v6  ;;  %v282_v7 = vadd.s32 %v281_v5, %v272_v29  ;;  %v179_v57 = vadd.s32 3, %v162_v51  ;;  %vm333_vm3 = vweird.f32 %v470_v9 }
  0x46   :  { %vm285_vm4 = vc.u32 %v260_v28, %v279_v48  ;;  %v284_v41 = vadd.s32 %v279_v48, %v260_v28 }
  0x47   :  { %v373_v13 = vadd.s32 4294967294, %v141_v4  ;;  %v286_v14 = vadd.s32 1, %v282_v7  ;;  %v180_v0 = vand.u32 3, %v179_v57 }
  0x49   :  { %vm374_vm5 = vcmp.lt.s32.totalorder %v373_v13, 0  ;;  %v287_v15 = vsel %vm285_vm4, %v286_v14, %v282_v7  ;;  %vm185_vm10 = vcmp.eq.s32.totalorder %v180_v0, 2  ;;  %vm182_vm12 = vcmp.eq.s32.totalorder %v180_v0, 0 }
  0x4a   :  { %v144_v16 = vsel %vm374_vm5, 0, %v373_v13  ;;  %v288_v19 = vadd.s32 %v287_v15, %v283_v11  ;;  %vm181_vm14 = vcmp.lt.s32.totalorder %v180_v0, 2 }
  0x4b   :  { %v145_v20 = vsub.s32 32, %v144_v16  ;;  %v146_v59 = vshll.u32 %v137_v60, %v144_v16  ;;  %v149_v21 = vsub.s32 4294967266, %v144_v16 }
  0x4c   :  { %v289_v22 = vadd.s32 536870912, %v288_v19 }
  0x4d   :  { %v147_v23 = vshrl.u32 %v129_v49, %v145_v20  ;;  %v150_v25 = vadd.s32 127, %v149_v21 }
  0x4e   :  { %v608_v26 = vshrl.u32 %v289_v22, 30 }
  0x4f   :  { %v148_v27 = vor.u32 %v147_v23, %v146_v59  ;;  %v151_v42 = vshll.u32 %v150_v25, 23 }
  0x50   :  { %v291_v24 = vshll.u32 %v608_v26, 30  ;;  %v314_v14 = vsub.s32 4, %v608_v26 }
  0x51   :  { %v152_v30 = vor.u32 4788187, %v151_v42  ;;  %v155_v32 = vcvt.s32.f32 %v148_v27 }
  0x52   :  { %v292_v33 = vsub.s32 %v288_v19, %v291_v24  ;;  %v315_v21 = vsel %vm192_vm11, %v314_v14, %v608_v26 }
  0x53   :  { %v153_v62 = vand.u32 2147483647, %v152_v30  ;;  %v317_v27 = vsel %vm629_vm13, 0, %v315_v21 }
  0x54   :  { %vm293_vm6 = vcmp.lt.s32.totalorder %v292_v33, 0  ;;  %v294_v3 = vsub.s32 0, %v292_v33 }
  0x55   :  { %v156_v34 = vmul.f32 %v155_v32, %v153_v62  ;;  %v334_v62 = vadd.s32 3, %v317_v27 }
  0x56   :  { %v295_v38 = vsel %vm293_vm6, %v294_v3, %v292_v33 }
  0x57   :  { %v157_v43 = vxor.u32 2147483648, %v156_v34  ;;  %v296_v44 = vclz %v295_v38  ;;  %v335_v38 = vand.u32 3, %v334_v62 }
  0x59   :  { %v158_v35 = vsel %vm37_vm7, %v157_v43, %v156_v34  ;;  %v376_v47 = vadd.s32 4294967294, %v296_v44  ;;  %vm340_vm0 = vcmp.eq.s32.totalorder %v335_v38, 2  ;;  %vm337_vm1 = vcmp.eq.s32.totalorder %v335_v38, 0 }
  0x5a   :  { %v161_v31 = vsel %vm615_vm8, %v468_v8, %v158_v35  ;;  %vm336_vm2 = vcmp.lt.s32.totalorder %v335_v38, 2 }
  0x5b   :  { %v163_v53 = vmul.f32 %v161_v31, %v161_v31  ;;  %vm377_vm9 = vcmp.lt.s32.totalorder %v376_v47, 0 }
  0x5c   :  { %v299_v10 = vsel %vm377_vm9, 0, %v376_v47 }
  0x5d   :  { %v164_v52 = vmul.f32 -0.001358992, %v163_v53  ;;  %v171_v46 = vmul.f32 -0.00019511016, %v163_v53  ;;  %v300_v54 = vsub.s32 32, %v299_v10  ;;  %v301_v55 = vshll.u32 %v292_v33, %v299_v10 }
  0x5e   :  { %v304_v17 = vsub.s32 4294967266, %v299_v10 }
  0x5f   :  { %v165_v56 = vadd.f32 0.041655596, %v164_v52  ;;  %v172_v37 = vadd.f32 0.008332121, %v171_v46  ;;  %v302_v50 = vshrl.u32 %v284_v41, %v300_v54 }
  0x60   :  { %v305_v58 = vadd.s32 127, %v304_v17 }
  0x61   :  { %v166_v60 = vmul.f32 %v165_v56, %v163_v53  ;;  %v173_v61 = vmul.f32 %v172_v37, %v163_v53  ;;  %v303_v63 = vor.u32 %v302_v50, %v301_v55 }
  0x62   :  { %v306_v18 = vshll.u32 %v305_v58, 23 }
  0x63   :  { %v167_v29 = vadd.f32 -0.4999988, %v166_v60  ;;  %v174_v39 = vadd.f32 -0.16666654, %v173_v61  ;;  %v310_v48 = vcvt.s32.f32 %v303_v63 }
  0x64   :  { %v307_v1 = vor.u32 4788187, %v306_v18 }
  0x65   :  { %v168_v2 = vmul.f32 %v167_v29, %v163_v53  ;;  %v175_v5 = vmul.f32 %v174_v39, %v163_v53 }
  0x66   :  { %v308_v6 = vand.u32 2147483647, %v307_v1 }
  0x67   :  { %v169_v28 = vadd.f32 1.0, %v168_v2  ;;  %v176_v4 = vadd.f32 1.0, %v175_v5 }
  0x68   :  { %v311_v7 = vmul.f32 %v310_v48, %v308_v6 }
  0x69   :  { %v177_v11 = vmul.f32 %v176_v4, %v161_v31  ;;  %v186_v13 = vxor.u32 2147483648, %v169_v28 }
  0x6a   :  { %v312_v15 = vxor.u32 2147483648, %v311_v7 }
  0x6b   :  { %v183_v16 = vxor.u32 2147483648, %v177_v11  ;;  %v187_v19 = vsel %vm185_vm10, %v186_v13, %v177_v11 }
  0x6c   :  { %v313_v20 = vsel %vm192_vm11, %v312_v15, %v311_v7 }
  0x6d   :  { %v184_v59 = vsel %vm182_vm12, %v169_v28, %v183_v16  ;;  %v316_v22 = vsel %vm629_vm13, %v470_v9, %v313_v20 }
  0x6e   :  { %v188_v23 = vsel %vm181_vm14, %v184_v59, %v187_v19  ;;  %v318_v25 = vmul.f32 %v316_v22, %v316_v22 }
  0x6f   :  { %v189_v12 = vsel %vm178_vm15, nan, %v188_v23 }
  0x70   :  { %v319_v42 = vmul.f32 -0.001358992, %v318_v25  ;;  %v326_v24 = vmul.f32 -0.00019511016, %v318_v25  ;;  %v345_v30 = vadd.f32 1.0, %v189_v12 }
  0x72   :  { %v320_v32 = vadd.f32 0.041655596, %v319_v42  ;;  %v327_v33 = vadd.f32 0.008332121, %v326_v24  ;;  %v347_v8 = vmul.f32 0.5, %v345_v30 }
  0x74   :  { %v321_v3 = vmul.f32 %v320_v32, %v318_v25  ;;  %v328_v34 = vmul.f32 %v327_v33, %v318_v25  ;;  %349 = vst [vmem:[#allocation5] sm:$0xff] %v347_v8 }
  0x76   :  { %v322_v26 = vadd.f32 -0.4999988, %v321_v3  ;;  %v329_v36 = vadd.f32 -0.16666654, %v328_v34 }
  0x78   :  { %v323_v40 = vmul.f32 %v322_v26, %v318_v25  ;;  %v330_v43 = vmul.f32 %v329_v36, %v318_v25 }
  0x7a   :  { %v324_v44 = vadd.f32 1.0, %v323_v40  ;;  %v331_v35 = vadd.f32 1.0, %v330_v43 }
  0x7c   :  { %v332_v45 = vmul.f32 %v331_v35, %v316_v22  ;;  %v341_v47 = vxor.u32 2147483648, %v324_v44 }
  0x7e   :  { %v338_v31 = vxor.u32 2147483648, %v332_v45  ;;  %v342_v53 = vsel %vm340_vm0, %v341_v47, %v332_v45 }
  0x80   :  { %v339_v41 = vsel %vm337_vm1, %v324_v44, %v338_v31 }
  0x81   :  { %v343_v51 = vsel %vm336_vm2, %v339_v41, %v342_v53 }
  0x82   :  { %v344_v10 = vsel %vm333_vm3, nan, %v343_v51 }
  0x83   :  { %v346_v52 = vadd.f32 1.0, %v344_v10 }
  0x85   :  { %v348_v46 = vmul.f32 0.5, %v346_v52 }
  0x87   :  { %350 = vst [vmem:[#allocation5 + $0x8] sm:$0xff] %v348_v46 }
  0x88   :  { %363 = dma.vmem_to_hbm [thread:$0]  %s356_s13, 256, %s358_s16, [#allocation4], %s442_s11, %s442_s11, %s443_s12  }
  0x89   :  { %439 = dma.done.wait [#allocation4], 256  }
  0x8a   :  { %440 = vsyncadd [#allocation4], 4294967040 }
  0x8b   :  { %368 = vsyncpa [#allocation3], 1 }
  0x8c   :  { %369 = vsyncpa [#allocation4], 1 }

</bundles_post_ra>
